<compile_context>
chip_gen: v5e
topology: v5e:2x2
jax: 0.10.0
libtpu: 0.0.40
codegen_flags: <defaults>
</compile_context>

<pallas_src>
import math

import jax
import jax.numpy as jnp
from jax.experimental import pallas as pl
from jax.experimental.pallas import tpu as pltpu


def _round_up(x, m):
    return ((x + m - 1) // m) * m


def _cdiv(a, b):
    return -(-a // b)


def _vmem_limit_bytes(io_block_bytes, f32_block_bytes):
    # 2x double-buffered (input + output) blocks + f32 working copies, 2x headroom.
    # Keep >= 32 MiB (v5e scoped default is only 16 MiB) and <= 48 MiB (v7x physical
    # VMEM is 64 MiB per TensorCore).
    need = 2 * 2 * io_block_bytes + 4 * f32_block_bytes
    return int(min(48 * 1024 * 1024, max(32 * 1024 * 1024, 2 * need)))


# -----------------------------------------------------------------------------
# Channels-first kernels: x block (1, C, TN); reduce over the channel (sublane) axis.
# Tokens on the lane axis => lane-dense stores even for small C.
# -----------------------------------------------------------------------------
def _make_cfirst_kernel(with_bias, post_scale, post_shift, eps):
    def kernel(*refs):
        if with_bias:
            x_ref, w_ref, b_ref, o_ref = refs
        else:
            x_ref, w_ref, o_ref = refs
        x = x_ref[...].astype(jnp.float32)                 # (1, C, TN)
        inv_c = 1.0 / x.shape[1]
        s1 = jnp.sum(x, axis=1, keepdims=True)             # (1, 1, TN)
        s2 = jnp.sum(x * x, axis=1, keepdims=True)         # (1, 1, TN)
        mean = s1 * inv_c
        var = jnp.maximum(s2 * inv_c - mean * mean, 0.0)   # biased variance
        inv = jax.lax.rsqrt(var + eps)                     # EUP rsqrt
        w = w_ref[...].astype(jnp.float32)                 # (1, C, 1)
        if with_bias:
            b = b_ref[...].astype(jnp.float32)             # (1, C, 1)
            y = (x - mean) * inv * w + b
        else:
            y = x * inv * w                                # BiasFree: numerator not centered
        if post_scale != 1.0 or post_shift != 0.0:         # fused data_transform
            y = y * post_scale + post_shift
        o_ref[...] = y.astype(o_ref.dtype)
    return kernel


def layernorm_nchw(x, weight, bias=None, *, eps=1e-5, post_scale=1.0,
                   post_shift=0.0, target_block_bytes=2 << 20):
    """LayerNorm over the channel axis of an NCHW (or (B, C, N)) tensor.

    bias=None  -> BiasFree_LayerNorm semantics.
    bias given -> WithBias_LayerNorm semantics (WMB default).
    post_scale/post_shift optionally fuse `data_transform` (2*y - 1) into the kernel.
    Equivalent to `to_4d(body(to_3d(x)), h, w)` without any transpose.
    """
    orig_shape = x.shape
    B, C = x.shape[0], x.shape[1]
    N = int(math.prod(x.shape[2:])) if len(x.shape) > 2 else 1
    assert weight.shape == (C,)
    with_bias = bias is not None
    if with_bias:
        assert bias.shape == (C,)
    x3 = x.reshape(B, C, N)
    itemsize = jnp.dtype(x.dtype).itemsize

    # Token tile (lane axis): multiple of 128, ~target_block_bytes per (C, TN) block.
    tn = max(128, (target_block_bytes // max(1, C * itemsize)) // 128 * 128)
    tn = min(tn, _round_up(N, 128))
    # Keep the grid splittable across v7x's two TensorCores when possible.
    if B * _cdiv(N, tn) < 2 and N > 128:
        tn = max(128, _round_up(_cdiv(N, 2), 128))

    n_pad = _round_up(N, tn)
    if n_pad != N:
        x3 = jnp.pad(x3, ((0, 0), (0, 0), (0, n_pad - N)))

    grid = (B, n_pad // tn)
    io_block = C * tn * itemsize
    vmem_limit = _vmem_limit_bytes(io_block, C * tn * 4)

    param_spec = pl.BlockSpec((1, C, 1), lambda b, j: (0, 0, 0))
    in_specs = [pl.BlockSpec((1, C, tn), lambda b, j: (b, 0, j)), param_spec]
    args = [x3, weight.reshape(1, C, 1)]
    if with_bias:
        in_specs.append(param_spec)
        args.append(bias.reshape(1, C, 1))

    out = pl.pallas_call(
        _make_cfirst_kernel(with_bias, float(post_scale), float(post_shift), float(eps)),
        out_shape=jax.ShapeDtypeStruct((B, C, n_pad), x.dtype),
        grid_spec=pltpu.PrefetchScalarGridSpec(
            num_scalar_prefetch=0,
            grid=grid,
            in_specs=in_specs,
            out_specs=pl.BlockSpec((1, C, tn), lambda b, j: (b, 0, j)),
        ),
        compiler_params=pltpu.CompilerParams(
            dimension_semantics=("parallel", "parallel"),
            vmem_limit_bytes=vmem_limit,
        ),
    )(*args)

    if n_pad != N:
        out = out[:, :, :N]
    return out.reshape(orig_shape)


# -----------------------------------------------------------------------------
# Channel-last kernels: x block (TM, C); reduce over the lane axis.
# Used when the tensor already lives in (..., C) layout.
# -----------------------------------------------------------------------------
def _make_rows_kernel(with_bias, post_scale, post_shift, eps):
    def kernel(*refs):
        if with_bias:
            x_ref, w_ref, b_ref, o_ref = refs
        else:
            x_ref, w_ref, o_ref = refs
        x = x_ref[...].astype(jnp.float32)                 # (TM, C)
        inv_c = 1.0 / x.shape[-1]
        s1 = jnp.sum(x, axis=-1, keepdims=True)            # (TM, 1)
        s2 = jnp.sum(x * x, axis=-1, keepdims=True)        # (TM, 1)
        mean = s1 * inv_c
        var = jnp.maximum(s2 * inv_c - mean * mean, 0.0)
        inv = jax.lax.rsqrt(var + eps)
        w = w_ref[...].astype(jnp.float32)                 # (1, C)
        if with_bias:
            b = b_ref[...].astype(jnp.float32)             # (1, C)
            y = (x - mean) * inv * w + b
        else:
            y = x * inv * w
        if post_scale != 1.0 or post_shift != 0.0:
            y = y * post_scale + post_shift
        o_ref[...] = y.astype(o_ref.dtype)
    return kernel


def layernorm_lastdim(x, weight, bias=None, *, eps=1e-5, post_scale=1.0,
                      post_shift=0.0, target_block_bytes=2 << 20):
    """LayerNorm over the last dim. x: (..., C); weight/bias: (C,)."""
    C = x.shape[-1]
    assert weight.shape == (C,)
    with_bias = bias is not None
    if with_bias:
        assert bias.shape == (C,)
    orig_shape = x.shape
    x2 = x.reshape(-1, C)
    R = x2.shape[0]
    itemsize = jnp.dtype(x.dtype).itemsize

    # Row tile: multiple of 8, ~target_block_bytes per (TM, C) block; cdiv grid with a
    # zero-padded tail (no tiny tail blocks for odd R).
    tm = max(8, (target_block_bytes // max(1, C * itemsize)) // 8 * 8)
    tm = min(tm, _round_up(R, 8))
    if _cdiv(R, tm) < 2 and R > 8:
        tm = max(8, _round_up(_cdiv(R, 2), 8))

    r_pad = _round_up(R, tm)
    if r_pad != R:
        x2 = jnp.pad(x2, ((0, r_pad - R), (0, 0)))

    grid = (r_pad // tm,)
    io_block = tm * C * itemsize
    vmem_limit = _vmem_limit_bytes(io_block, tm * C * 4)

    param_spec = pl.BlockSpec((1, C), lambda i: (0, 0))
    in_specs = [pl.BlockSpec((tm, C), lambda i: (i, 0)), param_spec]
    args = [x2, weight.reshape(1, C)]
    if with_bias:
        in_specs.append(param_spec)
        args.append(bias.reshape(1, C))

    out = pl.pallas_call(
        _make_rows_kernel(with_bias, float(post_scale), float(post_shift), float(eps)),
        out_shape=jax.ShapeDtypeStruct((r_pad, C), x.dtype),
        grid_spec=pltpu.PrefetchScalarGridSpec(
            num_scalar_prefetch=0,
            grid=grid,
            in_specs=in_specs,
            out_specs=pl.BlockSpec((tm, C), lambda i: (i, 0)),
        ),
        compiler_params=pltpu.CompilerParams(
            dimension_semantics=("parallel",),
            vmem_limit_bytes=vmem_limit,
        ),
    )(*args)

    if r_pad != R:
        out = out[:R]
    return out.reshape(orig_shape)


# -----------------------------------------------------------------------------
# WMB front-end helper: x -> data_transform(norm1(x)), as in WMB.forward.
# -----------------------------------------------------------------------------
def wmb_norm1_data_transform(x, weight, bias=None):
    """data_transform(LayerNorm(x)) with the 2*y - 1 fused into the norm kernel."""
    return layernorm_nchw(x, weight, bias, post_scale=2.0, post_shift=-1.0)


# -----------------------------------------------------------------------------
# Plain-JAX references
# -----------------------------------------------------------------------------
def _ref_nchw(x, weight, bias=None):
    mu = jnp.mean(x, axis=1, keepdims=True)
    var = jnp.mean((x - mu) ** 2, axis=1, keepdims=True)
    pshape = (1, x.shape[1]) + (1,) * (x.ndim - 2)
    w = weight.reshape(pshape)
    if bias is None:
        return x / jnp.sqrt(var + 1e-5) * w
    return (x - mu) / jnp.sqrt(var + 1e-5) * w + bias.reshape(pshape)


def _ref_lastdim(x, weight, bias=None):
    mu = jnp.mean(x, axis=-1, keepdims=True)
    var = jnp.mean((x - mu) ** 2, axis=-1, keepdims=True)
    if bias is None:
        return x / jnp.sqrt(var + 1e-5) * weight
    return (x - mu) / jnp.sqrt(var + 1e-5) * weight + bias


if __name__ == "__main__":
    key = jax.random.PRNGKey(0)
    k1, k2, k3, k4, k5, k6 = jax.random.split(key, 6)

    # --- Primary: WMB default (WithBias) on a (B, dim, H, W) map, with the
    #     data_transform (2*y - 1) that follows norm1 fused into the kernel. ---
    B, C, H, W = 2, 4, 16, 16
    x = jax.random.normal(k1, (B, C, H, W), dtype=jnp.float32)
    w_wb = jax.random.normal(k2, (C,), dtype=jnp.float32)
    b_wb = jax.random.normal(k3, (C,), dtype=jnp.float32)

    y = wmb_norm1_data_transform(x, w_wb, b_wb)
    y = jax.block_until_ready(y)
    ref = 2.0 * _ref_nchw(x, w_wb, b_wb) - 1.0
    assert jnp.allclose(y, ref, atol=1e-4, rtol=1e-4), "WithBias NCHW (+data_transform) mismatch"

    # --- Plain WithBias norm (norm2 usage, no data_transform) ---
    y2 = layernorm_nchw(x, w_wb, b_wb)
    assert jnp.allclose(y2, _ref_nchw(x, w_wb, b_wb), atol=1e-4, rtol=1e-4), \
        "WithBias NCHW mismatch"

    # --- BiasFree variant, odd spatial size (exercises lane padding) ---
    x_odd = jax.random.normal(k4, (2, 4, 5, 7), dtype=jnp.float32)
    w_bf = jax.random.normal(k5, (4,), dtype=jnp.float32)
    y_bf = layernorm_nchw(x_odd, w_bf)  # bias=None -> BiasFree
    assert jnp.allclose(y_bf, _ref_nchw(x_odd, w_bf), atol=1e-4, rtol=1e-4), \
        "BiasFree NCHW (odd spatial) mismatch"

    # --- Channel-last path, WithBias, odd row count (exercises row padding) ---
    x_cl = jax.random.normal(k6, (3, 5, 7, 48), dtype=jnp.float32)
    w_cl = jnp.ones((48,), dtype=jnp.float32)
    b_cl = jnp.zeros((48,), dtype=jnp.float32) + 0.1
    y_cl = layernorm_lastdim(x_cl, w_cl, b_cl)
    assert jnp.allclose(y_cl, _ref_lastdim(x_cl, w_cl, b_cl), atol=1e-4, rtol=1e-4), \
        "channel-last WithBias mismatch"

    print("KERNEL_OK")
</pallas_src>

<mosaic_0001>
module attributes {stable_mosaic.version = 11 : i64} {
  func.func @kernel(%arg0: i32, %arg1: i32, %arg2: memref<1x4x256xf32, #tpu.memory_space<vmem>>, %arg3: memref<1x4x1xf32, #tpu.memory_space<vmem>>, %arg4: memref<1x4x1xf32, #tpu.memory_space<vmem>>, %arg5: memref<1x4x256xf32, #tpu.memory_space<vmem>>) attributes {dimension_semantics = [#tpu.dimension_semantics<parallel>, #tpu.dimension_semantics<parallel>], iteration_bounds = array<i64: 2, 1>, scalar_prefetch = 0 : i64, scratch_operands = 0 : i64, tpu.core_type = #tpu.core_type<tc>, window_params = [{transform_indices = @transform_0, window_bounds = array<i64: 1, 4, 256>}, {pipeline_mode = #tpu.pipeline_mode<synchronous>, transform_indices = @transform_1, window_bounds = array<i64: 1, 4, 1>}, {pipeline_mode = #tpu.pipeline_mode<synchronous>, transform_indices = @transform_2, window_bounds = array<i64: 1, 4, 1>}, {transform_indices = @transform_3, window_bounds = array<i64: 1, 4, 256>}]} {
    %c0 = arith.constant 0 : index
    %c0_0 = arith.constant 0 : index
    %c0_1 = arith.constant 0 : index
    %0 = vector.load %arg2[%c0, %c0_0, %c0_1] : memref<1x4x256xf32, #tpu.memory_space<vmem>>, vector<1x4x256xf32>
    %cst = arith.constant dense<0.000000e+00> : vector<1x256xf32>
    %1 = vector.multi_reduction <add>, %0, %cst [1] : vector<1x4x256xf32> to vector<1x256xf32>
    %2 = vector.shape_cast %1 : vector<1x256xf32> to vector<1x1x256xf32>
    %3 = arith.mulf %0, %0 : vector<1x4x256xf32>
    %cst_2 = arith.constant dense<0.000000e+00> : vector<1x256xf32>
    %4 = vector.multi_reduction <add>, %3, %cst_2 [1] : vector<1x4x256xf32> to vector<1x256xf32>
    %5 = vector.shape_cast %4 : vector<1x256xf32> to vector<1x1x256xf32>
    %cst_3 = arith.constant 2.500000e-01 : f32
    %6 = vector.broadcast %cst_3 : f32 to vector<1x1x256xf32>
    %7 = arith.mulf %2, %6 : vector<1x1x256xf32>
    %cst_4 = arith.constant 2.500000e-01 : f32
    %8 = vector.broadcast %cst_4 : f32 to vector<1x1x256xf32>
    %9 = arith.mulf %5, %8 : vector<1x1x256xf32>
    %10 = arith.mulf %7, %7 : vector<1x1x256xf32>
    %11 = arith.subf %9, %10 : vector<1x1x256xf32>
    %cst_5 = arith.constant 0.000000e+00 : f32
    %12 = vector.broadcast %cst_5 : f32 to vector<1x1x256xf32>
    %13 = arith.maximumf %11, %12 : vector<1x1x256xf32>
    %cst_6 = arith.constant 9.99999974E-6 : f32
    %14 = vector.broadcast %cst_6 : f32 to vector<1x1x256xf32>
    %15 = arith.addf %13, %14 : vector<1x1x256xf32>
    %16 = math.rsqrt %15 : vector<1x1x256xf32>
    %c0_7 = arith.constant 0 : index
    %c0_8 = arith.constant 0 : index
    %c0_9 = arith.constant 0 : index
    %17 = vector.load %arg3[%c0_7, %c0_8, %c0_9] : memref<1x4x1xf32, #tpu.memory_space<vmem>>, vector<1x4x1xf32>
    %c0_10 = arith.constant 0 : index
    %c0_11 = arith.constant 0 : index
    %c0_12 = arith.constant 0 : index
    %18 = vector.load %arg4[%c0_10, %c0_11, %c0_12] : memref<1x4x1xf32, #tpu.memory_space<vmem>>, vector<1x4x1xf32>
    %19 = vector.broadcast %7 : vector<1x1x256xf32> to vector<1x4x256xf32>
    %20 = arith.subf %0, %19 : vector<1x4x256xf32>
    %21 = vector.broadcast %16 : vector<1x1x256xf32> to vector<1x4x256xf32>
    %22 = arith.mulf %20, %21 : vector<1x4x256xf32>
    %23 = vector.broadcast %17 : vector<1x4x1xf32> to vector<1x4x256xf32>
    %24 = arith.mulf %22, %23 : vector<1x4x256xf32>
    %25 = vector.broadcast %18 : vector<1x4x1xf32> to vector<1x4x256xf32>
    %26 = arith.addf %24, %25 : vector<1x4x256xf32>
    %cst_13 = arith.constant 2.000000e+00 : f32
    %27 = vector.broadcast %cst_13 : f32 to vector<1x4x256xf32>
    %28 = arith.mulf %26, %27 : vector<1x4x256xf32>
    %cst_14 = arith.constant -1.000000e+00 : f32
    %29 = vector.broadcast %cst_14 : f32 to vector<1x4x256xf32>
    %30 = arith.addf %28, %29 : vector<1x4x256xf32>
    %c0_15 = arith.constant 0 : index
    %c0_16 = arith.constant 0 : index
    %c0_17 = arith.constant 0 : index
    %31 = vector.load %arg5[%c0_15, %c0_16, %c0_17] : memref<1x4x256xf32, #tpu.memory_space<vmem>>, vector<1x4x256xf32>
    tpu.vector_store %arg5[%c0_15, %c0_16, %c0_17], %30 {strides = array<i32>} : memref<1x4x256xf32, #tpu.memory_space<vmem>>, vector<1x4x256xf32>,
    return
  }
  func.func @transform_0(%arg0: i32, %arg1: i32) -> (i32, i32, i32) {
    %c0_i32 = arith.constant 0 : i32
    %c0_i32_0 = arith.constant 0 : i32
    return %arg0, %c0_i32, %arg1 : i32, i32, i32
  }
  func.func @transform_1(%arg0: i32, %arg1: i32) -> (i32, i32, i32) {
    %c0_i32 = arith.constant 0 : i32
    %c0_i32_0 = arith.constant 0 : i32
    %c0_i32_1 = arith.constant 0 : i32
    %c0_i32_2 = arith.constant 0 : i32
    return %c0_i32, %c0_i32_0, %c0_i32_1 : i32, i32, i32
  }
  func.func @transform_2(%arg0: i32, %arg1: i32) -> (i32, i32, i32) {
    %c0_i32 = arith.constant 0 : i32
    %c0_i32_0 = arith.constant 0 : i32
    %c0_i32_1 = arith.constant 0 : i32
    %c0_i32_2 = arith.constant 0 : i32
    return %c0_i32, %c0_i32_0, %c0_i32_1 : i32, i32, i32
  }
  func.func @transform_3(%arg0: i32, %arg1: i32) -> (i32, i32, i32) {
    %c0_i32 = arith.constant 0 : i32
    %c0_i32_0 = arith.constant 0 : i32
    return %arg0, %c0_i32, %arg1 : i32, i32, i32
  }
}

</mosaic_0001>

<bundles_post_ra>
// kernel: tpu_custom_call.1
= control target key start
LH: loop header
LB: loop body
LE: loop exit
PB: predicated region body
PF: predicated region fallthrough
CT: control target
= control target key end

     0   :  { %8 = vsyncpa [#allocation3], 0  ;;  %s788_s0 = inlined_call_operand.hbm [shape: f32[2,4,256], index: 0, kind: input, shape index: {}]   ;;  %s789_s1 = inlined_call_operand.vmem [shape: f32[1,4,1], index: 1, kind: input, shape index: {}]   ;;  %s790_s2 = inlined_call_operand.vmem [shape: f32[1,4,1], index: 2, kind: input, shape index: {}]   ;;  %s791_s3 = inlined_call_operand.hbm [shape: f32[2,4,256], index: 3, kind: output, shape index: {}]  }
   0x1   :  { %10 = vsyncpa [#allocation3 + $0x1], 0 }
   0x2   :  { %11 = vsyncpa [#allocation4], 0 }
   0x3   :  { %13 = vsyncpa [#allocation4 + $0x1], 0  ;;  %s646_s12 = smov 0   ;;  %s648_s13 = smov 0  }
   0x4   :  { %s650_s14 = smov 0   ;;  %s652_s15 = smov 0  }
   0x5   :  { %s654_s16 = smov 0   ;;  %s656_s17 = smov 0  }
   0x6 LB: > { %s424_s18 = sadd.s32 4294967295, %s622_s17   ;;  %s425_s19 = sadd.s32 4294967294, %s622_s17   ;;  %s622_s17 = sphi %s656_s17, %s19_s17   ;;  %s618_s16 = sphi %s654_s16, %s800_s16   ;;  %s614_s15 = sphi %s652_s15, %s799_s15   ;;  %s610_s14 = sphi %s650_s14, %s798_s14   ;;  %s606_s13 = sphi %s648_s13, %s797_s13   ;;  %s602_s12 = sphi %s646_s12, %s796_s12  }
   0x7   : > { %s31_s20 = sadd.s32 1, %s618_s16  ;;  %s40_s21 = sadd.s32 1, %s610_s14 }
   0x8   : > { %p33_p0 = scmp.ge.s32.totalorder %s31_s20, 2  ;;  %p47_p1 = scmp.ne.s32.totalorder %s610_s14, %s606_s13 }
   0x9   : > { %p48_p2 = scmp.eq.s32.totalorder %s622_s17, 0  ;;  %p53_p3 = scmp.ne.s32.totalorder %s606_s13, %s602_s12 }
   0xa   : > { %s802_s20 = smov (%p33_p0, %s31_s20), 0  ;;  %p54_p5 = scmp.eq.s32.totalorder %s424_s18, 0 }
   0xb   : > { %p687_p4 = por %p48_p2, %p47_p1  ;;  %s35_s23 = ssub.s32 %s618_s16, %s802_s20 }
   0xc   : > { %p121_p6 = scmp.eq.s32.totalorder %s424_s18, 1  ;;  %p38_p7 = scmp.eq.s32.totalorder %s35_s23, 0 }
   0xd   : > { %p693_p8 = por %p54_p5, %p53_p3  ;;  %p127_p10 = scmp.eq.s32.totalorder %s425_s19, 1 }
   0xe   : > { %p697_p9 = por %p121_p6, %p47_p1  ;;  %p427_p12 = scmp.ge.s32.totalorder %s622_s17, 2 }
   0xf   : > { %s702_s26 = scalar_select %p38_p7, %s610_s14, %s40_s21  }
  0x10   : > { %p704_p11 = por %p127_p10, %p53_p3  ;;  %p453_p13 = scmp.lt.s32.totalorder %s622_s17, 2 }
  0x11   : > { %s153_s28 = sand.u32 1, %s610_s14   ;;  %s439_s30 = sshll.u32 %s618_s16, 3 }
  0x12   : > { %s428_s29 = sshll.u32 %s153_s28, 3  ;;  %s164_s6 = scalar_lea.hbm %s788_s0, %s439_s30 }
  0x13   : > { %s157_s7 = scalar_lea.vmem [#allocation2], %s428_s29  ;;  %s166_s9 = sshll.u32 %s164_s6, 4  ;;  %s167_s9 = int_to_ptr.hbm [resolvable:$true] %s166_s9 }
  0x14   : > { %s168_s8 = sshll.u32 %s157_s7, 4  ;;  %p446_p0 = pnand %p453_p13, %p687_p4  ;;  %s169_s8 = int_to_ptr.vmem [resolvable:$true] %s168_s8 }
  0x15   : > { %p431_p1 = scmp.ge.s32.totalorder %s622_s17, 1  ;;  %p173_p2 = scmp.lt.s32.totalorder %s622_s17, 3 }
  0x16   : > { %s154_s10 = scalar_lea.sflag [#allocation3], %s153_s28 }
  0x17   : > { %448 = dma.hbm_to_vmem [thread:$0]  (!%p446_p0), %s167_s9, 128, %s169_s8, %s154_s10  }
  0x18   : > { %p174_p3 = pnand %p431_p1, %p173_p2 }
  0x19   : > { %s720_s11 = sand.u32 (!%p174_p3), 1, %s606_s13  }
  0x1a   : > { %177 = sbr.rel (%p174_p3) target bundleno = 168 (0xa8), region = 32  ;;  %s432_s18 = sshll.u32 (!%p174_p3), %s720_s11, 3 }
  0x1b   : > { %s180_s19 = scalar_lea.sflag (!%p174_p3), [#allocation3], %s720_s11  ;;  %s183_s21 = scalar_lea.vmem (!%p174_p3), [#allocation2], %s432_s18 }
  0x1f   : > { %593 = dma.done.wait (%p693_p8), %s180_s19, 128  }
  0x20   : > { %595 = vsyncadd (%p693_p8), %s180_s19, 4294967168  ;;  %v624_v0 = vmov 0   ;;  %v284_v1 = vld [vmem:[%s789_s1] sm:$0xf]  ;;  %v736_v3 = vld [vmem:[%s183_s21] sm:$0xff]  ;;  %vm216_vm0 = vcmask 1043456  }
  0x21   : > { %505 = vset.pattern.permute.xlu0 %v624_v0  ;;  %v285_v2 = vld [vmem:[%s790_s2] sm:$0xf]  ;;  %211 = vst [vmem:[#allocation1] ss:$2 sm:$0xff] %v736_v3  ;;  %v231_v4 = vmul.f32 %v736_v3, %v736_v3  ;;  %v625_v63 = vmov 839922192  }
  0x22   : > { %300 = vperm.xlu0 %505, %v284_v1   ;;  %v303_v0 = vunpack.c.l.s4 %v625_v63  ;;  %s440_s24 = sshll.u32 %s614_s15, 3  ;;  %s206_s6 = scalar_lea.vmem [#allocation5], %s432_s18 }
  0x23   : > { %s335_s5 = scalar_lea.hbm %s791_s3, %s440_s24  ;;  %s337_s7 = sshll.u32 %s206_s6, 4  ;;  %s338_s7 = int_to_ptr.vmem [resolvable:$true] %s337_s7 }
  0x24   : > { %s339_s8 = sshll.u32 %s335_s5, 4  ;;  %s322_s9 = scalar_lea.sflag [#allocation4], %s720_s11  ;;  %s340_s8 = int_to_ptr.hbm [resolvable:$true] %s339_s8 }
  0x25   : > { %s554_s15 = sshra.s32 %s340_s8, 4  ;;  %s560_s22 = scalar_lea.hbm %s791_s3, 16  ;;  %s555_s15 = int_to_ptr.hbm [resolvable:$true] %s554_s15 }
  0x26   : > { %s556_s10 = scalar_lea.hbm %s555_s15, 8  ;;  %p561_p7 = scmp.lt.s32.totalorder %s555_s15, %s791_s3 }
  0x27   : > { %p557_p4 = scmp.ne.s32.totalorder %s555_s15, %s556_s10  ;;  %p562_p8 = scmp.lt.s32.totalorder %s560_s22, %s556_s10 }
  0x28   : > { %v212_v5 = vld.sshfl [vmem:[#allocation1] sm:$0xff pattern:$0x75316420]  ;;  %v213_v6 = vld.sshfl [vmem:[#allocation1 + $0x8] sm:$0xff pattern:$0x75316420] }
  0x29   : > { %233 = vst [vmem:[#allocation1] ss:$2 sm:$0xff] %v231_v4  ;;  %v224_v7 = vsel %vm216_vm0, %v213_v6, 0.0  ;;  %v217_v10 = vsel %vm216_vm0, %v212_v5, 0.0  ;;  %v304_v6 = vunpack.c.0.s8 %v303_v0  ;;  %p558_p5 = pnand %p557_p4, %p697_p9  ;;  %p563_p10 = por %p562_p8, %p561_p7 }
  0x2a   : > { %310 = vperm.xlu0 %505, %v285_v2   ;;  %v225_v8 = vrot.slane %v224_v7, 4  ;;  %v218_v12 = vrot.slane %v217_v10, 4 }
  0x2b   : > { %p559_p6 = pneg %p558_p5 }
  0x2c   : > { %v226_v13 = vadd.f32 %v225_v8, %v224_v7  ;;  %v219_v17 = vadd.f32 %v218_v12, %v217_v10 }
  0x2d   : > { %p564_p13 = pnand %p563_p10, %p559_p6 }
  0x2e   : > { %v227_v18 = vrot.slane %v226_v13, 2  ;;  %v220_v21 = vrot.slane %v219_v17, 2 }
  0x30   : > { %v235_v9 = vld.sshfl [vmem:[#allocation1 + $0x8] sm:$0xff pattern:$0x75316420]  ;;  %v234_v14 = vld.sshfl [vmem:[#allocation1] sm:$0xff pattern:$0x75316420]  ;;  %v228_v22 = vadd.f32 %v227_v18, %v226_v13  ;;  %v221_v25 = vadd.f32 %v220_v21, %v219_v17 }
  0x31   : > { %v245_v11 = vsel %vm216_vm0, %v235_v9, 0.0  ;;  %v238_v16 = vsel %vm216_vm0, %v234_v14, 0.0 }
  0x32   : > { %v246_v15 = vrot.slane %v245_v11, 4  ;;  %v239_v19 = vrot.slane %v238_v16, 4  ;;  %v229_v26 = vrot.slane %v228_v22, 1  ;;  %v222_v29 = vrot.slane %v221_v25, 1 }
  0x34   : > { %v247_v20 = vadd.f32 %v246_v15, %v245_v11  ;;  %v240_v23 = vadd.f32 %v239_v19, %v238_v16  ;;  %v230_v30 = vadd.f32 %v229_v26, %v228_v22  ;;  %v223_v33 = vadd.f32 %v222_v29, %v221_v25 }
  0x36   : > { %v248_v24 = vrot.slane %v247_v20, 2  ;;  %v241_v27 = vrot.slane %v240_v23, 2  ;;  %v253_v36 = vmul.f32 0.25, %v230_v30  ;;  %v252_v38 = vmul.f32 0.25, %v223_v33 }
  0x38   : > { %v249_v28 = vadd.f32 %v248_v24, %v247_v20  ;;  %v242_v31 = vadd.f32 %v241_v27, %v240_v23  ;;  %v257_v40 = vmul.f32 %v253_v36, %v253_v36  ;;  %v256_v42 = vmul.f32 %v252_v38, %v252_v38 }
  0x39   : > { %v288_v60 = vrot.slane %v253_v36, 4 }
  0x3a   : > { %v250_v32 = vrot.slane %v249_v28, 1  ;;  %v243_v34 = vrot.slane %v242_v31, 1 }
  0x3b   : > { %v289_v1 = vsel %vm216_vm0, %v252_v38, %v288_v60 }
  0x3c   : > { %v251_v35 = vadd.f32 %v250_v32, %v249_v28  ;;  %v244_v37 = vadd.f32 %v243_v34, %v242_v31  ;;  %v291_v7 = vsub.f32 %v736_v3, %v289_v1 }
  0x3e   : > { %v255_v39 = vmul.f32 0.25, %v251_v35  ;;  %v254_v41 = vmul.f32 0.25, %v244_v37 }
  0x40   : > { %v259_v43 = vsub.f32 %v255_v39, %v257_v40  ;;  %v258_v44 = vsub.f32 %v254_v41, %v256_v42 }
  0x42   : > { %v261_v45 = vmax.f32 %v259_v43, 0.0  ;;  %v260_v46 = vmax.f32 %v258_v44, 0.0 }
  0x44   : > { %v263_v47 = vadd.f32 1e-05, %v261_v45  ;;  %v262_v48 = vadd.f32 1e-05, %v260_v46 }
  0x46   : > { %506 = vrsqrt.f32 %v263_v47  ;;  %vm280_vm1 = vweird.f32 %v263_v47  ;;  %vm270_vm4 = vweird.f32 %v262_v48 }
  0x47   : > { %508 = vrsqrt.f32 %v262_v48 }
  0x4c   : > { %v507_v49 = vpop.eup %506 }
  0x4d   : > { %v275_v50 = vmul.f32 %v507_v49, %v263_v47  ;;  %v509_v51 = vpop.eup %508  ;;  %vm281_vm2 = vweird.f32 %v507_v49 }
  0x4e   : > { %v265_v52 = vmul.f32 %v509_v51, %v262_v48  ;;  %vm282_vm3 = vmor %vm280_vm1, %vm281_vm2  ;;  %vm271_vm5 = vweird.f32 %v509_v51 }
  0x4f   : > { %v276_v53 = vmul.f32 %v507_v49, %v275_v50  ;;  %vm272_vm6 = vmor %vm270_vm4, %vm271_vm5 }
  0x50   : > { %v266_v54 = vmul.f32 %v509_v51, %v265_v52 }
  0x51   : > { %v277_v55 = vmul.f32 0.5, %v276_v53 }
  0x52   : > { %v267_v56 = vmul.f32 0.5, %v266_v54 }
  0x53   : > { %v278_v57 = vsub.f32 1.5, %v277_v55 }
  0x54   : > { %v268_v58 = vsub.f32 1.5, %v267_v56 }
  0x55   : > { %v279_v59 = vmul.f32 %v507_v49, %v278_v57 }
  0x56   : > { %v269_v61 = vmul.f32 %v509_v51, %v268_v58 }
  0x57   : > { %v283_v62 = vsel %vm282_vm3, %v507_v49, %v279_v59 }
  0x58   : > { %v294_v2 = vrot.slane %v283_v62, 4  ;;  %v273_v4 = vsel %vm272_vm6, %v509_v51, %v269_v61 }
  0x5a   : > { %v295_v8 = vsel %vm216_vm0, %v273_v4, %v294_v2 }
  0x5b   : > { %v297_v9 = vmul.f32 %v295_v8, %v291_v7 }
  0x94   : > { %v301_v5 = vpop.permute.xlu0 %300 }
  0x95   : > { %v305_v10 = vperm.slane %v301_v5, %v304_v6 }
  0x97   : > { %v307_v12 = vmul.f32 %v305_v10, %v297_v9 }
  0x9c   : > { %v311_v11 = vpop.permute.xlu0 %310 }
  0x9d   : > { %v315_v13 = vperm.slane %v311_v11, %v304_v6 }
  0x9f   : > { %v317_v14 = vadd.f32 %v315_v13, %v307_v12 }
  0xa1   : > { %v318_v3 = vmul.f32 2.0, %v317_v14 }
  0xa3   : > { %v319_v15 = vadd.f32 -1.0, %v318_v3 }
  0xa5   : > { %320 = vst [vmem:[%s206_s6] sm:$0xff] %v319_v15 }
  0xa6   : > { %567 = shalt.err (!%p564_p13)
}
  0xa7   : > { %443 = dma.vmem_to_hbm [thread:$0]  (%p697_p9), %s338_s7, 128, %s340_s8, %s322_s9  }
  0xa8 PF: > { %s351_s11 = sand.u32 1, %s602_s12   ;;  %p450_p0 = pnand %p427_p12, %p704_p11 }
  0xa9   : > { %s352_s28 = scalar_lea.sflag [#allocation4], %s351_s11 }
  0xaa   : > { %p451_p1 = pneg %p450_p0 }
  0xac   : > { %597 = dma.done.wait (%p451_p1), %s352_s28, 128  }
  0xad   : > { %599 = vsyncadd (%p451_p1), %s352_s28, 4294967168  ;;  %s19_s17 = sadd.s32 1, %s622_s17   ;;  %s796_s12 = smov %s606_s13 }
  0xae   : > { %p16_p2 = scmp.ge.s32.totalorder %s19_s17, 4   ;;  %s797_s13 = smov %s610_s14 }
  0xaf   : > { %s798_s14 = smov %s702_s26  ;;  %s799_s15 = smov %s618_s16 }
  0xb0   : > { %s800_s16 = smov %s802_s20  ;;  %18 = sbr.rel (!%p16_p2) target bundleno = 6 (0x6), region = 77 }
  0xb5   :  { %358 = vsyncpa [#allocation3], 1 }
  0xb6   :  { %360 = vsyncpa [#allocation3 + $0x1], 1 }
  0xb7   :  { %361 = vsyncpa [#allocation4], 1 }
  0xb8   :  { %363 = vsyncpa [#allocation4 + $0x1], 1 }

</bundles_post_ra>
